<compile_context>
chip_gen: v7x
topology: tpu7x:2x2x1
jax: 0.10.0
libtpu: 0.0.40
codegen_flags: <defaults>
</compile_context>

<pallas_src>
import functools

import jax
import jax.numpy as jnp
from jax import lax
from jax.experimental import pallas as pl
from jax.experimental.pallas import tpu as pltpu


def _round_up(x, m):
    return ((x + m - 1) // m) * m


def _pick_tm(n, c, itemsize, vmem_budget_bytes, block_rows=None):
    """Row-block size: byte-budgeted, multiple of 8, or exactly n if small."""
    if block_rows is not None:
        tm = _round_up(int(block_rows), 8)
    else:
        # Per-row VMEM bytes (lane-padded): logits row + int32 label column
        # padded to 128 lanes (512 B).  x2 for double buffering of inputs.
        row_logits = _round_up(c, 128) * itemsize
        row_labels = 128 * 4
        per_row_db = 2 * (row_logits + row_labels)
        tm = max(8, (vmem_budget_bytes // per_row_db) // 8 * 8)
    # Block never exceeds the array; tm == n (any value) is a legal block dim.
    return n if tm >= n else tm


def _aexp_loss_kernel(inv_a, n_valid, pred_ref, lab_ref, out_ref):
    i = pl.program_id(0)
    tm, c = pred_ref.shape

    logits = pred_ref[...].astype(jnp.float32)              # (TM, C)
    lab = lab_ref[...]                                       # (TM, 1) int32

    # numerically-stable softmax prob of the labelled class, reusing exp()
    m = jnp.max(logits, axis=-1, keepdims=True)              # (TM, 1)
    e = jnp.exp(logits - m)                                   # (TM, C)
    denom = jnp.sum(e, axis=-1, keepdims=True)                # (TM, 1)
    cls_idx = lax.broadcasted_iota(jnp.int32, (tm, c), 1)
    numer = jnp.sum(jnp.where(cls_idx == lab, e, 0.0),
                    axis=-1, keepdims=True)                   # (TM, 1)
    p = numer * pl.reciprocal(denom, approx=True)             # softmax[true]
    loss_rows = jnp.exp(-p * inv_a)                           # (TM, 1)

    # mask rows past the true batch size (ragged last block; select => no
    # NaN/Inf propagation from the un-DMA'd tail of the block)
    row_idx = i * tm + lax.broadcasted_iota(jnp.int32, (tm, 1), 0)
    partial = jnp.sum(jnp.where(row_idx < n_valid, loss_rows, 0.0))

    # per-block partial sum (block-owned output => grid axis can be parallel)
    out_ref[...] = jnp.full((1, 8, 128), partial, dtype=jnp.float32)


def aexp_loss(pred, labels, *, num_classes, a=3.0, scale=1.0,
              block_rows=None, vmem_budget_bytes=8 * 1024 * 1024):
    """Pallas implementation of AExpLoss.forward. Returns a scalar loss."""
    n, c = pred.shape
    assert c == num_classes, (c, num_classes)

    itemsize = jnp.dtype(pred.dtype).itemsize
    tm = _pick_tm(n, c, itemsize, vmem_budget_bytes, block_rows)
    num_blocks = pl.cdiv(n, tm)

    # (N,) -> (N,1) int32 column (metadata-level reshape; no pad, no copy of pred)
    lab_col = labels.astype(jnp.int32).reshape(n, 1)

    kernel = functools.partial(_aexp_loss_kernel, float(1.0 / a), int(n))

    partials = pl.pallas_call(
        kernel,
        out_shape=jax.ShapeDtypeStruct((num_blocks, 8, 128), jnp.float32),
        grid=(num_blocks,),
        in_specs=[
            pl.BlockSpec((tm, c), lambda i: (i, 0)),   # logits row block
            pl.BlockSpec((tm, 1), lambda i: (i, 0)),   # labels row block
        ],
        out_specs=pl.BlockSpec((1, 8, 128), lambda i: (i, 0, 0)),
        compiler_params=pltpu.CompilerParams(
            dimension_semantics=("parallel",)),
        cost_estimate=pl.CostEstimate(
            flops=5 * n * c,
            transcendentals=n * (c + 2),
            bytes_accessed=n * c * itemsize + n * 4 + num_blocks * 8 * 128 * 4,
        ),
    )(pred, lab_col)

    return jnp.sum(partials[:, 0, 0]) * (scale / n)


def _reference(pred, labels, a, scale):
    probs = jax.nn.softmax(pred.astype(jnp.float32), axis=1)
    picked = probs[jnp.arange(pred.shape[0]), labels]
    return jnp.mean(jnp.exp(-picked / a)) * scale


if __name__ == "__main__":
    C = 10                   # module default num_classes
    a, scale = 3.0, 1.0

    key = jax.random.PRNGKey(0)
    k1, k2, k3, k4 = jax.random.split(key, 4)

    # Case 1: small batch, single block.
    pred = jax.random.normal(k1, (8, C), jnp.float32)
    labels = jax.random.randint(k2, (8,), 0, C, jnp.int32)
    out = aexp_loss(pred, labels, num_classes=C, a=a, scale=scale)
    jax.block_until_ready(out)
    ref = _reference(pred, labels, a, scale)
    assert jnp.allclose(out, ref, atol=2e-3, rtol=2e-3), (out, ref)

    # Case 2: non-divisible batch with forced multi-block grid — exercises the
    # cdiv grid, ragged-tail row mask, and per-block parallel partial sums.
    pred2 = jax.random.normal(k3, (37, C), jnp.float32)
    labels2 = jax.random.randint(k4, (37,), 0, C, jnp.int32)
    out2 = aexp_loss(pred2, labels2, num_classes=C, a=a, scale=scale,
                     block_rows=8)
    jax.block_until_ready(out2)
    ref2 = _reference(pred2, labels2, a, scale)
    assert jnp.allclose(out2, ref2, atol=2e-3, rtol=2e-3), (out2, ref2)

    print("KERNEL_OK")
</pallas_src>

<mosaic_0001>
module attributes {stable_mosaic.version = 11 : i64} {
  func.func @_aexp_loss_kernel(%arg0: i32, %arg1: memref<8x10xf32, #tpu.memory_space<vmem>>, %arg2: memref<8x1xi32, #tpu.memory_space<vmem>>, %arg3: memref<1x8x128xf32, #tpu.memory_space<vmem>>) attributes {dimension_semantics = [#tpu.dimension_semantics<parallel>], iteration_bounds = array<i64: 1>, scalar_prefetch = 0 : i64, scratch_operands = 0 : i64, tpu.core_type = #tpu.core_type<tc>, window_params = [{transform_indices = @transform_0, window_bounds = array<i64: 8, 10>}, {transform_indices = @transform_1, window_bounds = array<i64: 8, 1>}, {transform_indices = @transform_2, window_bounds = array<i64: 1, 8, 128>}]} {
    %c0 = arith.constant 0 : index
    %c0_0 = arith.constant 0 : index
    %0 = vector.load %arg1[%c0, %c0_0] : memref<8x10xf32, #tpu.memory_space<vmem>>, vector<8x10xf32>
    %c0_1 = arith.constant 0 : index
    %c0_2 = arith.constant 0 : index
    %1 = vector.load %arg2[%c0_1, %c0_2] : memref<8x1xi32, #tpu.memory_space<vmem>>, vector<8x1xi32>
    %cst = arith.constant dense<0xFF800000> : vector<8xf32>
    %2 = vector.multi_reduction <maximumf>, %0, %cst [1] : vector<8x10xf32> to vector<8xf32>
    %3 = vector.shape_cast %2 : vector<8xf32> to vector<8x1xf32>
    %4 = vector.broadcast %3 : vector<8x1xf32> to vector<8x10xf32>
    %5 = arith.subf %0, %4 : vector<8x10xf32>
    %6 = math.exp %5 : vector<8x10xf32>
    %cst_3 = arith.constant dense<0.000000e+00> : vector<8xf32>
    %7 = vector.multi_reduction <add>, %6, %cst_3 [1] : vector<8x10xf32> to vector<8xf32>
    %8 = vector.shape_cast %7 : vector<8xf32> to vector<8x1xf32>
    %9 = tpu.iota {dimensions = array<i32: 1>} : vector<8x10xi32>
    %10 = vector.broadcast %1 : vector<8x1xi32> to vector<8x10xi32>
    %11 = arith.cmpi eq, %9, %10 : vector<8x10xi32>
    %cst_4 = arith.constant 0.000000e+00 : f32
    %12 = vector.broadcast %cst_4 : f32 to vector<8x10xf32>
    %13 = arith.select %11, %6, %12 : vector<8x10xi1>, vector<8x10xf32>
    %cst_5 = arith.constant dense<0.000000e+00> : vector<8xf32>
    %14 = vector.multi_reduction <add>, %13, %cst_5 [1] : vector<8x10xf32> to vector<8xf32>
    %15 = vector.shape_cast %14 : vector<8xf32> to vector<8x1xf32>
    %16 = tpu.reciprocal %8 {approx = true} : vector<8x1xf32> -> vector<8x1xf32>
    %17 = arith.mulf %15, %16 : vector<8x1xf32>
    %cst_6 = arith.constant 0.000000e+00 : f32
    %18 = vector.broadcast %cst_6 : f32 to vector<8x1xf32>
    %19 = arith.subf %18, %17 : vector<8x1xf32>
    %cst_7 = arith.constant 0.333333343 : f32
    %20 = vector.broadcast %cst_7 : f32 to vector<8x1xf32>
    %21 = arith.mulf %19, %20 : vector<8x1xf32>
    %22 = math.exp %21 : vector<8x1xf32>
    %c8_i32 = arith.constant 8 : i32
    %23 = arith.muli %arg0, %c8_i32 : i32
    %24 = tpu.iota {dimensions = array<i32: 0>} : vector<8x1xi32>
    %25 = vector.broadcast %23 : i32 to vector<8x1xi32>
    %26 = arith.addi %25, %24 : vector<8x1xi32>
    %c8_i32_8 = arith.constant 8 : i32
    %27 = vector.broadcast %c8_i32_8 : i32 to vector<8x1xi32>
    %28 = arith.cmpi slt, %26, %27 : vector<8x1xi32>
    %cst_9 = arith.constant 0.000000e+00 : f32
    %29 = vector.broadcast %cst_9 : f32 to vector<8x1xf32>
    %30 = arith.select %28, %22, %29 : vector<8x1xi1>, vector<8x1xf32>
    %31 = vector.shape_cast %30 : vector<8x1xf32> to vector<1x8x1xf32>
    %cst_10 = arith.constant dense<0.000000e+00> : vector<1xf32>
    %32 = vector.multi_reduction <add>, %31, %cst_10 [1, 2] : vector<1x8x1xf32> to vector<1xf32>
    %33 = vector.shape_cast %32 : vector<1xf32> to vector<1x1x1xf32>
    %34 = vector.extract %33[0, 0, 0] : f32 from vector<1x1x1xf32>
    %35 = vector.broadcast %34 : f32 to vector<1x8x128xf32>
    %c0_11 = arith.constant 0 : index
    %c0_12 = arith.constant 0 : index
    %c0_13 = arith.constant 0 : index
    %36 = vector.load %arg3[%c0_11, %c0_12, %c0_13] : memref<1x8x128xf32, #tpu.memory_space<vmem>>, vector<1x8x128xf32>
    tpu.vector_store %arg3[%c0_11, %c0_12, %c0_13], %35 {strides = array<i32>} : memref<1x8x128xf32, #tpu.memory_space<vmem>>, vector<1x8x128xf32>,
    return
  }
  func.func @transform_0(%arg0: i32) -> (i32, i32) {
    %c0_i32 = arith.constant 0 : i32
    %c0_i32_0 = arith.constant 0 : i32
    return %arg0, %c0_i32 : i32, i32
  }
  func.func @transform_1(%arg0: i32) -> (i32, i32) {
    %c0_i32 = arith.constant 0 : i32
    %c0_i32_0 = arith.constant 0 : i32
    return %arg0, %c0_i32 : i32, i32
  }
  func.func @transform_2(%arg0: i32) -> (i32, i32, i32) {
    %c0_i32 = arith.constant 0 : i32
    %c0_i32_0 = arith.constant 0 : i32
    %c0_i32_1 = arith.constant 0 : i32
    return %arg0, %c0_i32, %c0_i32_0 : i32, i32, i32
  }
}

</mosaic_0001>

<bundles_post_ra>
// kernel: tpu_custom_call.1
= control target key start
LH: loop header
LB: loop body
LE: loop exit
PB: predicated region body
PF: predicated region fallthrough
CT: control target
= control target key end

     0   :  { %vm14_vm0 = vcmask 80896   ;;  %s147_s0 = inlined_call_operand.vmem [shape: f32[8,10], index: 0, kind: input, shape index: {}]   ;;  %s148_s1 = inlined_call_operand.vmem [shape: s32[8,1], index: 1, kind: input, shape index: {}]   ;;  %s149_s2 = inlined_call_operand.hbm [shape: f32[1,8,128], index: 2, kind: output, shape index: {}]  }
   0x1   :  { %v12_v0 = vld [vmem:[%s147_s0] sm:$0xff] }
   0x2   :  { %7 = vsyncpa [#allocation3], 0  ;;  %v15_v1 = vsel %vm14_vm0, %v12_v0, -inf  ;;  %v109_v2 = vmov 0   ;;  %v13_v3 = vld [vmem:[%s148_s1] sm:$0xff]  ;;  %v24_v7 = vlaneseq  ;;  %vm47_vm2 = vcmask 7168  }
   0x3   :  { %78 = vset.pattern.permute.xlu0 %v109_v2  ;;  %s110_s0 = smov [#allocation2]  }
   0x4   :  { %16 = vmax.xlane.f32.xlu0 %v15_v1  ;;  %v25_v8 = vand.u32 127, %v24_v7  ;;  %s66_s1 = sshll.u32 %s110_s0, 4  ;;  %s67_s1 = int_to_ptr.vmem [resolvable:$true] %s66_s1 }
   0x5   :  { %s85_s14 = scalar_lea.vmem %s67_s1, 128  ;;  %p90_p1 = scmp.lt.s32.totalorder %s67_s1, %s67_s1 }
   0x6   :  { %p86_p0 = scmp.ne.s32.totalorder %s67_s1, %s85_s14  ;;  %p91_p2 = scmp.lt.s32.totalorder %s85_s14, %s85_s14 }
   0x8   :  { %p92_p3 = por %p91_p2, %p90_p1 }
   0xa   :  { %p93_p4 = pnand %p92_p3, %p86_p0 }
  0x1a   :  { %27 = vperm.xlu0 %78, %v13_v3  }
  0x91   :  { %v17_v4 = vpop.xlane.xlu0 %16 }
  0x92   :  { %v18_v5 = vsub.f32 %v12_v0, %v17_v4 }
  0x94   :  { %v19_v6 = vmul.f32 1.442695, %v18_v5 }
  0x96   :  { %79 = vpow2.f32 %v19_v6 }
  0x99   :  { %v28_v9 = vpop.permute.xlu0 %27 }
  0x9a   :  { %vm29_vm1 = vcmp.eq.s32.totalorder %v25_v8, %v28_v9 }
  0xa0   :  { %v80_v10 = vpop.eup %79 }
  0xa1   :  { %v21_v11 = vsel %vm14_vm0, %v80_v10, 0.0  ;;  %v30_v12 = vsel %vm29_vm1, %v80_v10, 0.0 }
  0xa2   :  { %22 = vadd.xlane.f32.xlu1 %v21_v11  ;;  %v31_v13 = vsel %vm14_vm0, %v30_v12, 0.0 }
  0xa6   :  { %32 = vadd.xlane.f32.xlu1 %v31_v13 }
 0x12f   :  { %v23_v14 = vpop.xlane.xlu1 %22 }
 0x130   :  { %81 = vrcp.f32 %v23_v14 }
 0x133   :  { %v33_v16 = vpop.xlane.xlu1 %32 }
 0x13a   :  { %v82_v15 = vpop.eup %81 }
 0x13b   :  { %v35_v17 = vmul.f32 %v82_v15, %v33_v16 }
 0x13d   :  { %v36_v18 = vsub.f32 0.0, %v35_v17 }
 0x13f   :  { %v37_v19 = vmul.f32 0.33333334, %v36_v18 }
 0x141   :  { %v38_v20 = vmul.f32 1.442695, %v37_v19 }
 0x143   :  { %83 = vpow2.f32 %v38_v20 }
 0x14d   :  { %v84_v21 = vpop.eup %83 }
 0x14e   :  { %v48_v22 = vsel %vm47_vm2, %v84_v21, 0.0 }
 0x14f   :  { %49 = vadd.xlane.f32.xlu1 %v48_v22 }
 0x1dc   :  { %v50_v23 = vpop.xlane.xlu1 %49 }
 0x1dd   :  { %v51_v24 = vrot.slane %v50_v23, 4 }
 0x1df   :  { %v52_v25 = vadd.f32 %v51_v24, %v50_v23 }
 0x1e1   :  { %v53_v26 = vrot.slane %v52_v25, 2 }
 0x1e3   :  { %v54_v27 = vadd.f32 %v53_v26, %v52_v25 }
 0x1e5   :  { %v55_v28 = vrot.slane %v54_v27, 1 }
 0x1e7   :  { %v56_v29 = vadd.f32 %v55_v28, %v54_v27 }
 0x1e9   :  { %74 = vpush %v56_v29 }
 0x21a   :  { %s75_s13 = spop %74 }
 0x21b   :  { %v58_v30 = vstv %s75_s13 }
 0x21c   :  { %59 = vst [vmem:[#allocation2] sm:$0xff] %v58_v30 }
 0x21d   :  { %96 = shalt.err (!%p93_p4)
}
 0x21e   :  { %s97_s17 = scalar_lea.hbm %s149_s2, 128 }
 0x21f   :  { %p98_p5 = scmp.ne.s32.totalorder %s149_s2, %s97_s17  ;;  %p101_p6 = scmp.lt.u32.totalorder %s97_s17, %s149_s2 }
 0x221   :  { %p103_p7 = pnand %p101_p6, %p98_p5 }
 0x223   :  { %106 = shalt.err (!%p103_p7)
}
 0x224   :  { %69 = dma.vmem_to_hbm [thread:$0]  %s67_s1, 128, %s149_s2, [#allocation3]  }
 0x225   :  { %107 = dma.done.wait [#allocation3], 128  }
 0x226   :  { %108 = vsyncadd [#allocation3], 4294967168 }
 0x227   :  { %73 = vsyncpa [#allocation3], 1 }

</bundles_post_ra>
